<compile_context>
chip_gen: v6e
topology: v6e:2x2x1
jax: 0.10.0
libtpu: 0.0.40
codegen_flags: <defaults>
</compile_context>

<pallas_src>
import jax
import jax.numpy as jnp
from jax.experimental import pallas as pl
from jax.experimental.pallas import tpu as pltpu


def _round_up(x, m):
    return ((x + m - 1) // m) * m


def _dfl_kernel(pred_ref, label_ref, loss_ref):
    """Distribution Focal Loss for one tile of samples.

    pred_ref  : (T, C)  logits (native dtype, before softmax)
    label_ref : (1, T)  float32 continuous target distance
    loss_ref  : (1, T)  float32 per-sample loss
    """
    # (T, C) -> (C, T): put the sample axis on the 128-lane axis.  Transpose
    # in the source dtype (half the relayout traffic for bf16), cast after.
    pred = jnp.transpose(pred_ref[...]).astype(jnp.float32)      # (C, T)
    label = label_ref[...]                                        # (1, T)

    # Numerically stable log-sum-exp over the bin (sublane) axis.
    m = jnp.max(pred, axis=0, keepdims=True)                      # (1, T)
    lse = m + jnp.log(jnp.sum(jnp.exp(pred - m), axis=0, keepdims=True))

    # Fused weighted one-hot gather:
    #   w[c, t] = max(0, 1 - |c - label[t]|)
    # which equals w_left at c == floor(label), w_right at c == floor(label)+1
    # and 0 elsewhere (the clamp for an out-of-range right bin falls out free).
    bins = jax.lax.broadcasted_iota(jnp.int32, pred.shape, 0).astype(jnp.float32)
    w = jnp.maximum(1.0 - jnp.abs(bins - label), 0.0)             # (C, T)
    gathered = jnp.sum(w * pred, axis=0, keepdims=True)           # (1, T)

    # (w_left + w_right) == 1, so the loss is simply lse - gathered.
    loss_ref[...] = lse - gathered


def distribution_focal_loss_pallas(pred, label, *, tile_n=16384):
    """Per-sample DFL loss, shape (N,), computed with a Pallas TPU kernel.

    pred  : (N, C) logits in their native dtype (f32 or bf16).
    label : (N,)   continuous target distances in [0, C-1].
    """
    N, C = pred.shape
    itemsize = jnp.dtype(pred.dtype).itemsize

    # --- tile selection (always a multiple of 128 samples) -------------------
    # Cap the tile so the double-buffered (tile, C) pred block (lane-padded to
    # 128 lanes in VMEM -> tile * 128 * itemsize bytes per buffer) stays under
    # ~16 MiB; f32 -> 16384 samples, bf16 -> 32768.
    vmem_budget = 16 * 1024 * 1024
    max_tile_vmem = max(128, (vmem_budget // (2 * 128 * itemsize)) // 128 * 128)
    tile = min(_round_up(max(int(tile_n), 128), 128), max_tile_vmem)
    # Keep >= 2 grid steps when there is enough work so the "parallel" axis
    # can shard across v7x's two TensorCores (harmless ~0.35us on v5e/v6e).
    if N >= 256:
        tile = min(tile, _round_up(pl.cdiv(N, 2), 128))
    tile = min(tile, _round_up(N, 128))
    grid = pl.cdiv(N, tile)

    # label / loss travel as lane-dense (1, N) slabs (full-lane unmasked vst).
    # pred is NOT padded or copied: the final ragged block just reads/writes
    # unspecified tail lanes, which are discarded by the [:N] slice below.
    label_2d = label.astype(jnp.float32).reshape(1, N)

    loss = pl.pallas_call(
        _dfl_kernel,
        out_shape=jax.ShapeDtypeStruct((1, N), jnp.float32),
        grid_spec=pltpu.PrefetchScalarGridSpec(
            num_scalar_prefetch=0,
            grid=(grid,),
            in_specs=[
                pl.BlockSpec((tile, C), lambda i: (i, 0)),   # pred, native dtype
                pl.BlockSpec((1, tile), lambda i: (0, i)),   # label, lane-dense
            ],
            out_specs=pl.BlockSpec((1, tile), lambda i: (0, i)),
        ),
        compiler_params=pltpu.CompilerParams(
            dimension_semantics=("parallel",),
            # Headroom above v5e's 16 MiB scoped default; well under v7x's
            # 64 MiB physical (actual use is ~20-25 MiB at the largest tile).
            vmem_limit_bytes=48 * 1024 * 1024,
        ),
    )(pred, label_2d)
    # IMPORTANT: slice off the ragged tail before any reduction.
    return loss[0, :N]


class DistributionFocalLoss:
    """JAX/Pallas port of mmdet's DistributionFocalLoss forward."""

    def __init__(self, reduction="mean", loss_weight=1.0):
        assert reduction in ("none", "mean", "sum")
        self.reduction = reduction
        self.loss_weight = loss_weight

    def __call__(self, pred, target, weight=None, avg_factor=None,
                 reduction_override=None):
        assert reduction_override in (None, "none", "mean", "sum")
        reduction = reduction_override if reduction_override else self.reduction

        loss = distribution_focal_loss_pallas(pred, target)   # (N,)

        # weighted_loss semantics: element-wise weight, then reduce.
        if weight is not None:
            loss = loss * weight.astype(loss.dtype)

        if reduction == "none":
            out = loss
        elif reduction == "sum":
            out = jnp.sum(loss)
        else:  # mean
            if avg_factor is None:
                out = jnp.mean(loss)
            else:
                out = jnp.sum(loss) / avg_factor
        return self.loss_weight * out


def _reference_dfl(pred, label):
    """Pure-JAX reference for correctness check."""
    left = jnp.floor(label)
    w_left = (left + 1.0) - label
    w_right = label - left
    logp = jax.nn.log_softmax(pred.astype(jnp.float32), axis=-1)
    li = left.astype(jnp.int32)
    ri = jnp.minimum(li + 1, pred.shape[-1] - 1)
    ce_l = -jnp.take_along_axis(logp, li[:, None], axis=-1)[:, 0]
    ce_r = -jnp.take_along_axis(logp, ri[:, None], axis=-1)[:, 0]
    return ce_l * w_left + ce_r * w_right


if __name__ == "__main__":
    key = jax.random.PRNGKey(0)
    k1, k2 = jax.random.split(key)

    N = 400          # ragged sample count (exercises the ragged final block)
    n_max = 16       # max of integral set {0, ..., n}  ->  C = n + 1 bins
    C = n_max + 1

    pred = jax.random.normal(k1, (N, C), dtype=jnp.float32)
    target = jax.random.uniform(k2, (N,), dtype=jnp.float32,
                                minval=0.0, maxval=float(n_max) - 1e-3)

    ref_per_sample = _reference_dfl(pred, target)

    # Module forward (mean reduction; default tile -> 2 ragged grid steps).
    loss_mod = DistributionFocalLoss(reduction="mean", loss_weight=1.0)
    out = jax.block_until_ready(loss_mod(pred, target))
    ref_mean = jnp.mean(ref_per_sample)
    assert jnp.allclose(out, ref_mean, rtol=1e-5, atol=1e-5), (out, ref_mean)

    # Small-tile grid (grid=4) with a ragged final block, per-sample check.
    per_sample = jax.block_until_ready(
        distribution_focal_loss_pallas(pred, target, tile_n=128))
    assert per_sample.shape == (N,)
    assert jnp.allclose(per_sample, ref_per_sample, rtol=1e-5, atol=1e-5)

    print("KERNEL_OK")
</pallas_src>

<mosaic_0001>
module attributes {stable_mosaic.version = 11 : i64} {
  func.func @_dfl_kernel(%arg0: i32, %arg1: memref<256x17xf32, #tpu.memory_space<vmem>>, %arg2: memref<1x256xf32, #tpu.memory_space<vmem>>, %arg3: memref<1x256xf32, #tpu.memory_space<vmem>>) attributes {dimension_semantics = [#tpu.dimension_semantics<parallel>], iteration_bounds = array<i64: 2>, scalar_prefetch = 0 : i64, scratch_operands = 0 : i64, tpu.core_type = #tpu.core_type<tc>, window_params = [{transform_indices = @transform_0, window_bounds = array<i64: 256, 17>}, {transform_indices = @transform_1, window_bounds = array<i64: 1, 256>}, {transform_indices = @transform_2, window_bounds = array<i64: 1, 256>}]} {
    %c0 = arith.constant 0 : index
    %c0_0 = arith.constant 0 : index
    %0 = vector.load %arg1[%c0, %c0_0] : memref<256x17xf32, #tpu.memory_space<vmem>>, vector<256x17xf32>
    %1 = tpu.transpose %0, [1, 0] : vector<256x17xf32> -> vector<17x256xf32>
    %c0_1 = arith.constant 0 : index
    %c0_2 = arith.constant 0 : index
    %2 = vector.load %arg2[%c0_1, %c0_2] : memref<1x256xf32, #tpu.memory_space<vmem>>, vector<1x256xf32>
    %cst = arith.constant dense<0xFF800000> : vector<256xf32>
    %3 = vector.multi_reduction <maximumf>, %1, %cst [0] : vector<17x256xf32> to vector<256xf32>
    %4 = vector.shape_cast %3 : vector<256xf32> to vector<1x256xf32>
    %5 = vector.broadcast %4 : vector<1x256xf32> to vector<17x256xf32>
    %6 = arith.subf %1, %5 : vector<17x256xf32>
    %7 = math.exp %6 : vector<17x256xf32>
    %cst_3 = arith.constant dense<0.000000e+00> : vector<256xf32>
    %8 = vector.multi_reduction <add>, %7, %cst_3 [0] : vector<17x256xf32> to vector<256xf32>
    %9 = vector.shape_cast %8 : vector<256xf32> to vector<1x256xf32>
    %10 = math.log %9 : vector<1x256xf32>
    %11 = arith.addf %4, %10 : vector<1x256xf32>
    %12 = tpu.iota {dimensions = array<i32: 0>} : vector<17x256xi32>
    %13 = arith.sitofp %12 : vector<17x256xi32> to vector<17x256xf32>
    %14 = vector.broadcast %2 : vector<1x256xf32> to vector<17x256xf32>
    %15 = arith.subf %13, %14 : vector<17x256xf32>
    %16 = math.absf %15 : vector<17x256xf32>
    %cst_4 = arith.constant 1.000000e+00 : f32
    %17 = vector.broadcast %cst_4 : f32 to vector<17x256xf32>
    %18 = arith.subf %17, %16 : vector<17x256xf32>
    %cst_5 = arith.constant 0.000000e+00 : f32
    %19 = vector.broadcast %cst_5 : f32 to vector<17x256xf32>
    %20 = arith.maximumf %18, %19 : vector<17x256xf32>
    %21 = arith.mulf %20, %1 : vector<17x256xf32>
    %cst_6 = arith.constant dense<0.000000e+00> : vector<256xf32>
    %22 = vector.multi_reduction <add>, %21, %cst_6 [0] : vector<17x256xf32> to vector<256xf32>
    %23 = vector.shape_cast %22 : vector<256xf32> to vector<1x256xf32>
    %24 = arith.subf %11, %23 : vector<1x256xf32>
    %c0_7 = arith.constant 0 : index
    %c0_8 = arith.constant 0 : index
    %25 = vector.load %arg3[%c0_7, %c0_8] : memref<1x256xf32, #tpu.memory_space<vmem>>, vector<1x256xf32>
    tpu.vector_store %arg3[%c0_7, %c0_8], %24 {strides = array<i32>} : memref<1x256xf32, #tpu.memory_space<vmem>>, vector<1x256xf32>,
    return
  }
  func.func @transform_0(%arg0: i32) -> (i32, i32) {
    %c0_i32 = arith.constant 0 : i32
    %c0_i32_0 = arith.constant 0 : i32
    return %arg0, %c0_i32 : i32, i32
  }
  func.func @transform_1(%arg0: i32) -> (i32, i32) {
    %c0_i32 = arith.constant 0 : i32
    %c0_i32_0 = arith.constant 0 : i32
    return %c0_i32, %arg0 : i32, i32
  }
  func.func @transform_2(%arg0: i32) -> (i32, i32) {
    %c0_i32 = arith.constant 0 : i32
    %c0_i32_0 = arith.constant 0 : i32
    return %c0_i32, %arg0 : i32, i32
  }
}

</mosaic_0001>

<bundles_post_ra>
// kernel: tpu_custom_call.1
= control target key start
LH: loop header
LB: loop body
LE: loop exit
PB: predicated region body
PF: predicated region fallthrough
CT: control target
= control target key end

     0   :  { %7 = vsyncpa [#allocation3], 0  ;;  %s851_s0 = inlined_call_operand.vmem [shape: f32[400,17], index: 0, kind: input, shape index: {}]   ;;  %s852_s1 = inlined_call_operand.vmem [shape: f32[1,400], index: 1, kind: input, shape index: {}]   ;;  %s853_s2 = inlined_call_operand.hbm [shape: f32[1,400], index: 2, kind: output, shape index: {}]  }
   0x1   :  { %9 = vsyncpa [#allocation3 + $0x1], 0  ;;  %s665_s9 = smov 0   ;;  %s667_s10 = smov 0  }
   0x2   :  { %s669_s11 = smov 0   ;;  %s671_s12 = smov 0  }
   0x3 LB: > { %s686_s13 = sadd.s32 4294967295, %s646_s12   ;;  %s516_s14 = sadd.s32 4294967294, %s646_s12   ;;  %s646_s12 = sphi %s671_s12, %s859_s12   ;;  %s642_s11 = sphi %s669_s11, %s858_s11   ;;  %s638_s10 = sphi %s667_s10, %s857_s10   ;;  %s634_s9 = sphi %s665_s9, %s856_s9  }
   0x4   : > { %s690_s15 = sadd.s32 1, %s646_s12   ;;  %s74_s16 = sadd.s32 1, %s642_s11 }
   0x5   : > { %s71_s17 = ssub.s32 %s646_s12, %s690_s15  ;;  %p84_p0 = scmp.ne.s32.totalorder %s642_s11, %s638_s10 }
   0x6   : > { %p72_p1 = scmp.eq.s32.totalorder %s71_s17, 0  ;;  %p85_p2 = scmp.eq.s32.totalorder %s686_s13, 1 }
   0x7   : > { %p90_p3 = scmp.ne.s32.totalorder %s638_s10, %s634_s9  ;;  %p91_p4 = scmp.eq.s32.totalorder %s516_s14, 1 }
   0x8   : > { %s701_s18 = scalar_select %p72_p1, %s642_s11, %s74_s16  }
   0x9   : > { %p703_p5 = por %p85_p2, %p84_p0  ;;  %p707_p6 = por %p91_p4, %p90_p3 }
   0xa   : > { %p519_p7 = scmp.ge.s32.totalorder %s646_s12, 1  ;;  %p134_p8 = scmp.lt.s32.totalorder %s646_s12, 3 }
   0xc   : > { %p135_p9 = pnand %p519_p7, %p134_p8 }
   0xd   : > { %s714_s21 = sshll.u32 (!%p135_p9), %s686_s13, 5  ;;  %s523_s27 = sshll.u32 (!%p135_p9), %s686_s13, 1 }
   0xe   : > { %138 = sbr.rel (%p135_p9) target bundleno = 251 (0xfb), region = 28  ;;  %p169_p10 = scmp.lt.s32.totalorder (!%p135_p9), %s714_s21, 49 }
   0xf   : > { %p179_p11 = scmp.lt.s32.totalorder (!%p135_p9), %s523_s27, 3  ;;  %s161_s3 = sand.u32 (!%p135_p9), 1, %s638_s10  }
  0x10   : > { %s520_s4 = sshll.u32 (!%p135_p9), %s161_s3, 1  ;;  %s446_s13 = scalar_lea.hbm (!%p135_p9), %s853_s2, %s714_s21 }
  0x11   : > { %s163_s5 = scalar_lea.vmem (!%p135_p9), [#allocation2], %s520_s4  ;;  %s434_s14 = scalar_lea.sflag (!%p135_p9), [#allocation3], %s161_s3 }
  0x12   : > { %s448_s6 = sshll.u32 (!%p135_p9), %s163_s5, 4  ;;  %s649_s17 = smov (!%p135_p9), [#allocation2]   ;;  %s449_s6 = int_to_ptr.vmem [resolvable:$true] %s448_s6 }
  0x13   : > { %s170_s22 = scalar_select %p169_p10, %s714_s21, 49  ;;  %vm281_vm0 = vcmask 1040384   ;;  %v342_v48 = vlaneseq }
  0x14   : > { %s861_s27 = smov (!%p179_p11, %s523_s27), 3  ;;  %s586_s16 = scalar_lea.vmem %s449_s6, 32 }
  0x15   : > { %s522_s23 = sshll.u32 %s170_s22, 3  ;;  %v777_v53 = vshrl.u32 %v342_v48, 7  ;;  %s181_s30 = scalar_lea.vmem %s852_s1, %s861_s27  ;;  %vm430_vm1 = vcmp.lt.s32.totalorder %v342_v48, 256 }
  0x16   : > { %s721_s26 = scalar_lea.vmem %s851_s0, %s522_s23  ;;  %v280_v61 = vld [vmem:[%s181_s30] sm:$0x3]  ;;  %p587_p12 = scmp.ne.s32.totalorder %s449_s6, %s586_s16 }
  0x17   : > { %v200_v0 = vld [vmem:[%s721_s26 + $0x80] sm:$0xff]  ;;  %v201_v2 = vld [vmem:[%s721_s26 + $0x88] sm:$0xff]  ;;  %v202_v4 = vld [vmem:[%s721_s26 + $0x90] sm:$0xff]  ;;  %v345_v56 = vadd.s32 16, %v777_v53  ;;  %v344_v57 = vadd.s32 8, %v777_v53  ;;  %v356_v60 = vsub.s32 1, %v777_v53 }
  0x18   : > { %v184_v1 = vld [vmem:[%s721_s26] sm:$0xff]  ;;  %248 = vxpose.xlu1.b32.start [1/16] (narrow) %v200_v0, 24  ;;  %v185_v3 = vld [vmem:[%s721_s26 + $0x8] sm:$0xff]  ;;  %v186_v5 = vld [vmem:[%s721_s26 + $0x10] sm:$0xff]  ;;  %p588_p13 = pnand %p587_p12, %p703_p5  ;;  %s590_s22 = sshll.u32 %s649_s17, 4  ;;  %s591_s22 = int_to_ptr.vmem [resolvable:$false] %s590_s22 }
  0x19   : > { %216 = vxpose.xlu0.b32.start [1/16] (narrow) %v184_v1, 24  ;;  %v203_v6 = vld [vmem:[%s721_s26 + $0x98] sm:$0xff]  ;;  %v204_v8 = vld [vmem:[%s721_s26 + $0xa0] sm:$0xff]  ;;  %v205_v10 = vld [vmem:[%s721_s26 + $0xa8] sm:$0xff]  ;;  %s592_s23 = scalar_lea.vmem %s591_s22, 64  ;;  %p593_p1 = scmp.lt.s32.totalorder %s449_s6, %s591_s22 }
  0x1a   : > { %v187_v7 = vld [vmem:[%s721_s26 + $0x18] sm:$0xff]  ;;  %v188_v9 = vld [vmem:[%s721_s26 + $0x20] sm:$0xff]  ;;  %v189_v11 = vld [vmem:[%s721_s26 + $0x28] sm:$0xff]  ;;  %p589_p0 = pneg %p588_p13  ;;  %p594_p2 = scmp.lt.s32.totalorder %s592_s23, %s586_s16 }
  0x1b   : > { %v206_v12 = vld [vmem:[%s721_s26 + $0xb0] sm:$0xff]  ;;  %v207_v14 = vld [vmem:[%s721_s26 + $0xb8] sm:$0xff]  ;;  %v208_v16 = vld [vmem:[%s721_s26 + $0xc0] sm:$0xff] }
  0x1c   : > { %249 = vxpose.xlu1.b32.cont [2/16] (narrow) %v201_v2, 24  ;;  %v190_v13 = vld [vmem:[%s721_s26 + $0x30] sm:$0xff]  ;;  %v191_v15 = vld [vmem:[%s721_s26 + $0x38] sm:$0xff]  ;;  %v192_v17 = vld [vmem:[%s721_s26 + $0x40] sm:$0xff]  ;;  %v352_v2 = vsub.s32 0, %v777_v53  ;;  %p595_p3 = por %p594_p2, %p593_p1 }
  0x1d   : > { %217 = vxpose.xlu0.b32.cont [2/16] (narrow) %v185_v3, 24  ;;  %v209_v18 = vld [vmem:[%s721_s26 + $0xc8] sm:$0xff]  ;;  %v210_v20 = vld [vmem:[%s721_s26 + $0xd0] sm:$0xff]  ;;  %v211_v22 = vld [vmem:[%s721_s26 + $0xd8] sm:$0xff]  ;;  %v348_v3 = vcvt.s32.f32 %v345_v56 }
  0x1e   : > { %v193_v19 = vld [vmem:[%s721_s26 + $0x48] sm:$0xff]  ;;  %v194_v21 = vld [vmem:[%s721_s26 + $0x50] sm:$0xff]  ;;  %v195_v23 = vld [vmem:[%s721_s26 + $0x58] sm:$0xff]  ;;  %p596_p4 = pnand %p595_p3, %p589_p0 }
  0x1f   : > { %v212_v24 = vld [vmem:[%s721_s26 + $0xe0] sm:$0xff]  ;;  %v213_v26 = vld [vmem:[%s721_s26 + $0xe8] sm:$0xff]  ;;  %v214_v28 = vld [vmem:[%s721_s26 + $0xf0] sm:$0xff] }
  0x20   : > { %250 = vxpose.xlu1.b32.cont [3/16] (narrow) %v202_v4, 24  ;;  %v196_v25 = vld [vmem:[%s721_s26 + $0x60] sm:$0xff]  ;;  %v197_v27 = vld [vmem:[%s721_s26 + $0x68] sm:$0xff]  ;;  %v198_v29 = vld [vmem:[%s721_s26 + $0x70] sm:$0xff] }
  0x21   : > { %218 = vxpose.xlu0.b32.cont [3/16] (narrow) %v186_v5, 24  ;;  %v215_v30 = vld [vmem:[%s721_s26 + $0xf8] sm:$0xff] }
  0x22   : > { %v199_v31 = vld [vmem:[%s721_s26 + $0x78] sm:$0xff] }
  0x24   : > { %251 = vxpose.xlu1.b32.cont [4/16] (narrow) %v203_v6, 24  ;;  %v347_v6 = vcvt.s32.f32 %v344_v57 }
  0x25   : > { %219 = vxpose.xlu0.b32.cont [4/16] (narrow) %v187_v7, 24 }
  0x28   : > { %252 = vxpose.xlu1.b32.cont [5/16] (narrow) %v204_v8, 24 }
  0x29   : > { %220 = vxpose.xlu0.b32.cont [5/16] (narrow) %v188_v9, 24 }
  0x2c   : > { %253 = vxpose.xlu1.b32.cont [6/16] (narrow) %v205_v10, 24  ;;  %v357_v10 = vrot.slane %v280_v61, %v356_v60 }
  0x2d   : > { %221 = vxpose.xlu0.b32.cont [6/16] (narrow) %v189_v11, 24 }
  0x30   : > { %254 = vxpose.xlu1.b32.cont [7/16] (narrow) %v206_v12, 24  ;;  %v346_v12 = vcvt.s32.f32 %v777_v53 }
  0x31   : > { %222 = vxpose.xlu0.b32.cont [7/16] (narrow) %v190_v13, 24 }
  0x34   : > { %255 = vxpose.xlu1.b32.cont [8/16] (narrow) %v207_v14, 24  ;;  %v353_v14 = vrot.slane %v280_v61, %v352_v2 }
  0x35   : > { %223 = vxpose.xlu0.b32.cont [8/16] (narrow) %v191_v15, 24  ;;  %v365_v15 = vsub.f32 %v348_v3, %v357_v10 }
  0x38   : > { %256 = vxpose.xlu1.b32.cont [9/16] (narrow) %v208_v16, 24 }
  0x39   : > { %224 = vxpose.xlu0.b32.cont [9/16] (narrow) %v192_v17, 24  ;;  %v363_v17 = vsub.f32 %v347_v6, %v357_v10 }
  0x3c   : > { %257 = vxpose.xlu1.b32.cont [10/16] (narrow) %v209_v18, 24  ;;  %v364_v18 = vsub.f32 %v348_v3, %v353_v14 }
  0x3d   : > { %225 = vxpose.xlu0.b32.cont [10/16] (narrow) %v193_v19, 24  ;;  %v361_v19 = vsub.f32 %v346_v12, %v357_v10 }
  0x40   : > { %258 = vxpose.xlu1.b32.cont [11/16] (narrow) %v210_v20, 24  ;;  %v362_v20 = vsub.f32 %v347_v6, %v353_v14 }
  0x41   : > { %226 = vxpose.xlu0.b32.cont [11/16] (narrow) %v194_v21, 24  ;;  %v371_v21 = vand.u32 2147483647, %v365_v15 }
  0x44   : > { %259 = vxpose.xlu1.b32.cont [12/16] (narrow) %v211_v22, 24  ;;  %v360_v22 = vsub.f32 %v346_v12, %v353_v14 }
  0x45   : > { %227 = vxpose.xlu0.b32.cont [12/16] (narrow) %v195_v23, 24  ;;  %v369_v23 = vand.u32 2147483647, %v363_v17 }
  0x48   : > { %260 = vxpose.xlu1.b32.cont [13/16] (narrow) %v212_v24, 24  ;;  %v370_v24 = vand.u32 2147483647, %v364_v18 }
  0x49   : > { %228 = vxpose.xlu0.b32.cont [13/16] (narrow) %v196_v25, 24  ;;  %v367_v25 = vand.u32 2147483647, %v361_v19 }
  0x4c   : > { %261 = vxpose.xlu1.b32.cont [14/16] (narrow) %v213_v26, 24  ;;  %v368_v26 = vand.u32 2147483647, %v362_v20 }
  0x4d   : > { %229 = vxpose.xlu0.b32.cont [14/16] (narrow) %v197_v27, 24  ;;  %v377_v27 = vsub.f32 1.0, %v371_v21 }
  0x50   : > { %262 = vxpose.xlu1.b32.cont [15/16] (narrow) %v214_v28, 24  ;;  %v366_v28 = vand.u32 2147483647, %v360_v22 }
  0x51   : > { %230 = vxpose.xlu0.b32.cont [15/16] (narrow) %v198_v29, 24  ;;  %v375_v29 = vsub.f32 1.0, %v369_v23 }
  0x54   : > { %263 = vxpose.xlu1.b32.end [16/16] (narrow) %v215_v30, 24  ;;  %v376_v30 = vsub.f32 1.0, %v370_v24 }
  0x55   : > { %231 = vxpose.xlu0.b32.end [16/16] (narrow) %v199_v31, 24  ;;  %v373_v31 = vsub.f32 1.0, %v367_v25 }
  0x94   : > { %v755_v32 = vpop.trf.xlu1 }
  0x95   : > { %v757_v33 = vpop.trf.xlu0 }
  0x98   : > { %v759_v34 = vpop.trf.xlu1 }
  0x99   : > { %v761_v35 = vpop.trf.xlu0 }
  0x9c   : > { %v763_v36 = vpop.trf.xlu1 }
  0x9d   : > { %v765_v37 = vpop.trf.xlu0  ;;  %v291_v38 = vsel %vm281_vm0, %v763_v36, -inf }
  0x9e   : > { %v282_v39 = vsel %vm281_vm0, %v765_v37, -inf  ;;  %v292_v40 = vmax.f32 %v755_v32, %v291_v38  ;;  %v374_v38 = vsub.f32 1.0, %v368_v26  ;;  %v648_v26 = vmov 1966171168  }
  0x9f   : > { %v283_v41 = vmax.f32 %v757_v33, %v282_v39 }
  0xa0   : > { %v293_v42 = vmax.f32 %v292_v40, %v759_v34  ;;  %v383_v40 = vmax.f32 %v377_v27, 0.0  ;;  %v414_v27 = vunpack.c.l.s4 %v648_v26 }
  0xa1   : > { %v284_v43 = vmax.f32 %v283_v41, %v761_v35 }
  0xa2   : > { %v294_v44 = vrot.slane %v293_v42, 4 }
  0xa3   : > { %v285_v45 = vrot.slane %v284_v43, 4 }
  0xa4   : > { %v295_v46 = vmax.f32 %v293_v42, %v294_v44  ;;  %v372_v42 = vsub.f32 1.0, %v366_v28 }
  0xa5   : > { %v286_v47 = vmax.f32 %v284_v43, %v285_v45  ;;  %v381_v43 = vmax.f32 %v375_v29, 0.0 }
  0xa6   : > { %v296_v49 = vrot.slane %v295_v46, 2  ;;  %v378_v57 = vmax.f32 %v372_v42, 0.0 }
  0xa7   : > { %v287_v50 = vrot.slane %v286_v47, 2  ;;  %v387_v60 = vmul.f32 %v381_v43, %v759_v34 }
  0xa8   : > { %v297_v51 = vmax.f32 %v295_v46, %v296_v49  ;;  %v382_v46 = vmax.f32 %v376_v30, 0.0  ;;  %v379_v49 = vmax.f32 %v373_v31, 0.0 }
  0xa9   : > { %v288_v52 = vmax.f32 %v286_v47, %v287_v50  ;;  %v380_v50 = vmax.f32 %v374_v38, 0.0 }
  0xaa   : > { %v298_v54 = vrot.slane %v297_v51, 1 }
  0xab   : > { %v289_v55 = vrot.slane %v288_v52, 1  ;;  %v386_v2 = vmul.f32 %v380_v50, %v761_v35 }
  0xac   : > { %v784_v58 = vmax.f32 %v297_v51, %v298_v54 }
  0xad   : > { %v786_v59 = vmax.f32 %v288_v52, %v289_v55  ;;  %v389_v55 = vmul.f32 %v383_v40, %v763_v36  ;;  %v415_v40 = vunpack.c.0.s8 %v414_v27 }
  0xae   : > { %v301_v62 = vsub.f32 %v755_v32, %v784_v58  ;;  %v303_v63 = vsub.f32 %v759_v34, %v784_v58  ;;  %v305_v0 = vsub.f32 %v763_v36, %v784_v58  ;;  %v384_v36 = vmul.f32 %v378_v57, %v757_v33 }
  0xaf   : > { %v300_v1 = vsub.f32 %v757_v33, %v786_v59  ;;  %v302_v4 = vsub.f32 %v761_v35, %v786_v59  ;;  %v304_v5 = vsub.f32 %v765_v37, %v786_v59 }
  0xb0   : > { %v308_v7 = vmul.f32 1.442695, %v301_v62  ;;  %v312_v8 = vmul.f32 1.442695, %v303_v63  ;;  %v316_v9 = vmul.f32 1.442695, %v305_v0  ;;  %v388_v0 = vmul.f32 %v382_v46, %v765_v37 }
  0xb1   : > { %v306_v11 = vmul.f32 1.442695, %v300_v1  ;;  %v310_v13 = vmul.f32 1.442695, %v302_v4  ;;  %v314_v16 = vmul.f32 1.442695, %v304_v5  ;;  %v385_v1 = vmul.f32 %v379_v49, %v755_v32 }
  0xb2   : > { %570 = vpow2.f32 %v308_v7  ;;  %v400_v5 = vsel %vm281_vm0, %v389_v55, 0.0  ;;  %v391_v34 = vsel %vm281_vm0, %v388_v0, 0.0 }
  0xb3   : > { %572 = vpow2.f32 %v312_v8  ;;  %v399_v6 = vadd.f32 %v387_v60, %v385_v1 }
  0xb4   : > { %574 = vpow2.f32 %v316_v9  ;;  %v390_v9 = vadd.f32 %v386_v2, %v384_v36 }
  0xb5   : > { %576 = vpow2.f32 %v306_v11  ;;  %v401_v10 = vadd.f32 %v400_v5, %v399_v6 }
  0xb6   : > { %578 = vpow2.f32 %v310_v13  ;;  %v392_v13 = vadd.f32 %v391_v34, %v390_v9 }
  0xb7   : > { %580 = vpow2.f32 %v314_v16  ;;  %v402_v14 = vrot.slane %v401_v10, 4 }
  0xb8   : > { %v393_v17 = vrot.slane %v392_v13, 4 }
  0xb9   : > { %v403_v33 = vadd.f32 %v402_v14, %v401_v10 }
  0xba   : > { %v394_v19 = vadd.f32 %v393_v17, %v392_v13 }
  0xbb   : > { %v404_v20 = vrot.slane %v403_v33, 2 }
  0xbc   : > { %v395_v21 = vrot.slane %v394_v19, 2 }
  0xbd   : > { %v405_v22 = vadd.f32 %v404_v20, %v403_v33 }
  0xbe   : > { %v396_v23 = vadd.f32 %v395_v21, %v394_v19 }
  0xbf   : > { %v571_v39 = vpop.eup %570  ;;  %v406_v25 = vrot.slane %v405_v22, 1 }
  0xc0   : > { %v573_v41 = vpop.eup %572  ;;  %v397_v29 = vrot.slane %v396_v23, 1 }
  0xc1   : > { %v575_v44 = vpop.eup %574  ;;  %v327_v45 = vadd.f32 %v573_v41, %v571_v39  ;;  %v407_v38 = vadd.f32 %v406_v25, %v405_v22 }
  0xc2   : > { %v577_v47 = vpop.eup %576  ;;  %v328_v51 = vsel %vm281_vm0, %v575_v44, 0.0  ;;  %v398_v43 = vadd.f32 %v397_v29, %v396_v23 }
  0xc3   : > { %v579_v52 = vpop.eup %578  ;;  %v329_v54 = vadd.f32 %v328_v51, %v327_v45  ;;  %v418_v45 = vsub.s32 %v415_v40, %v777_v53 }
  0xc4   : > { %v581_v56 = vpop.eup %580  ;;  %v318_v61 = vadd.f32 %v579_v52, %v577_v47 }
  0xc5   : > { %v330_v62 = vrot.slane %v329_v54, 4  ;;  %v319_v63 = vsel %vm281_vm0, %v581_v56, 0.0 }
  0xc6   : > { %v320_v3 = vadd.f32 %v319_v63, %v318_v61 }
  0xc7   : > { %v331_v4 = vadd.f32 %v330_v62, %v329_v54 }
  0xc8   : > { %v321_v7 = vrot.slane %v320_v3, 4 }
  0xc9   : > { %v332_v8 = vrot.slane %v331_v4, 2 }
  0xca   : > { %v322_v11 = vadd.f32 %v321_v7, %v320_v3 }
  0xcb   : > { %v333_v12 = vadd.f32 %v332_v8, %v331_v4 }
  0xcc   : > { %v323_v37 = vrot.slane %v322_v11, 2 }
  0xcd   : > { %v334_v32 = vrot.slane %v333_v12, 1 }
  0xce   : > { %v324_v35 = vadd.f32 %v323_v37, %v322_v11 }
  0xcf   : > { %v335_v15 = vadd.f32 %v334_v32, %v333_v12 }
  0xd0   : > { %v325_v16 = vrot.slane %v324_v35, 1 }
  0xd1   : > { %582 = vlog2.f32 %v335_v15 }
  0xd2   : > { %v326_v18 = vadd.f32 %v325_v16, %v324_v35 }
  0xd4   : > { %584 = vlog2.f32 %v326_v18 }
  0xde   : > { %v583_v24 = vpop.eup %582 }
  0xdf   : > { %v339_v28 = vmul.f32 0.6931472, %v583_v24 }
  0xe1   : > { %v585_v30 = vpop.eup %584  ;;  %v341_v31 = vadd.f32 %v339_v28, %v784_v58 }
  0xe2   : > { %v337_v39 = vmul.f32 0.6931472, %v585_v30 }
  0xe3   : > { %v409_v41 = vsub.f32 %v341_v31, %v407_v38 }
  0xe4   : > { %v340_v42 = vadd.f32 %v337_v39, %v786_v59 }
  0xe6   : > { %v408_v44 = vsub.f32 %v340_v42, %v398_v43 }
  0xe8   : > { %v412_v46 = vcombine.low %v408_v44, %v409_v41 }
  0xea   : > { %v419_v47 = vrot.slane %v412_v46, %v418_v45 }
  0xec   : > { %v426_v58 = vrot.slane %v419_v47, %v418_v45 }
  0xee   : > { %432 = vst.msk [vmem:[%s163_s5] sm:$0x3] %vm430_vm1, %v426_v58 }
  0xef   : > { %599 = shalt.err (!%p596_p4)
}
  0xf0   : > { %s600_s24 = scalar_lea.hbm %s446_s13, 32  ;;  %s604_s26 = scalar_lea.hbm %s853_s2, 64 }
  0xf1   : > { %p601_p7 = scmp.ne.s32.totalorder %s446_s13, %s600_s24  ;;  %p605_p10 = scmp.lt.s32.totalorder %s446_s13, %s853_s2 }
  0xf2   : > { %p606_p11 = scmp.lt.s32.totalorder %s604_s26, %s600_s24 }
  0xf3   : > { %p602_p8 = pnand %p601_p7, %p703_p5 }
  0xf4   : > { %p607_p12 = por %p606_p11, %p605_p10 }
  0xf5   : > { %p603_p9 = pneg %p602_p8 }
  0xf7   : > { %p608_p13 = pnand %p607_p12, %p603_p9 }
  0xf9   : > { %611 = shalt.err (!%p608_p13)
}
  0xfa   : > { %530 = dma.vmem_to_hbm [thread:$0]  (%p703_p5), %s449_s6, 32, %s446_s13, %s434_s14  }
  0xfb PF: > { %p536_p0 = scmp.ge.s32.totalorder %s646_s12, 2  ;;  %s460_s29 = sand.u32 1, %s634_s9  }
  0xfc   : > { %s461_s30 = scalar_lea.sflag [#allocation3], %s460_s29 }
  0xfd   : > { %p533_p1 = pnand %p536_p0, %p707_p6 }
  0xff   : > { %p534_p2 = pneg %p533_p1 }
 0x101   : > { %629 = dma.done.wait (%p534_p2), %s461_s30, 32  }
 0x102   : > { %631 = vsyncadd (%p534_p2), %s461_s30, 4294967264  ;;  %p12_p3 = scmp.ge.s32.totalorder %s690_s15, 4   ;;  %s856_s9 = smov %s638_s10 }
 0x103   : > { %s857_s10 = smov %s642_s11  ;;  %s858_s11 = smov %s701_s18 }
 0x104   : > { %s859_s12 = smov %s690_s15  ;;  %14 = sbr.rel (!%p12_p3) target bundleno = 3 (0x3), region = 66 }
 0x109   :  { %466 = vsyncpa [#allocation3], 1 }
 0x10a   :  { %468 = vsyncpa [#allocation3 + $0x1], 1 }

</bundles_post_ra>
